<compile_context>
chip_gen: v6e
topology: v6e:2x2x1
jax: 0.10.0
libtpu: 0.0.40
codegen_flags: <defaults>
</compile_context>

<pallas_src>
import jax
import jax.numpy as jnp
from jax.experimental import pallas as pl
from jax.experimental.pallas import tpu as pltpu

NUM_CLASSES = 10
IN_FEATURES = 28 * 28   # 784
N_PAD = 128             # lane-dense output width (>= NUM_CLASSES)
MAX_TB = 2048           # batch tile: double-buffered f32 x ~12.5 MiB, fits scoped VMEM


def _round_up(x, m):
    return ((x + m - 1) // m) * m


def _linear_kernel(x_ref, w_ref, b_ref, o_ref):
    # x_ref: [TB, K] f32 (streamed), w_ref: [K, N_PAD] bf16 (resident),
    # b_ref: [1, N_PAD] f32 (resident), o_ref: [TB, N_PAD] bf16
    x_bf16 = x_ref[...].astype(jnp.bfloat16)          # in-VMEM cast, hidden under DMA
    acc = jnp.dot(x_bf16, w_ref[...], preferred_element_type=jnp.float32)
    o_ref[...] = (acc + b_ref[...]).astype(o_ref.dtype)


def prepare_params(w, b, n_pad=N_PAD):
    """One-time prep: transpose W to [K, N], zero-pad N -> n_pad, cast to bf16.

    w: [N, K] f32 (PyTorch nn.Linear layout), b: [N] f32.
    Returns (w_t_pad [K, n_pad] bf16, b_pad [1, n_pad] f32).
    """
    N, K = w.shape
    w_t_pad = jnp.zeros((K, n_pad), jnp.bfloat16).at[:, :N].set(
        jnp.transpose(w).astype(jnp.bfloat16))
    b_pad = jnp.zeros((1, n_pad), jnp.float32).at[:, :N].set(
        b.astype(jnp.float32))
    return w_t_pad, b_pad


def classifier_forward(x, w_t_pad, b_pad, num_classes=NUM_CLASSES):
    """x: [B, C, H, W] (or any [B, ...]) f32; w_t_pad: [K, N_PAD] bf16; b_pad: [1, N_PAD] f32."""
    B = x.shape[0]
    x_flat = x.reshape(B, -1)              # flatten only; NO dtype cast (stream f32 once)
    K = x_flat.shape[1]
    n_pad = w_t_pad.shape[1]

    # Tile choice:
    #  * B <= 8: a single full-array block (block dim == array dim satisfies the
    #    (8,128) rule).
    #  * B  > 8: at least 2 grid steps (v7x second TC), rows a multiple of 8,
    #    capped at MAX_TB. Partial last block is masked by Pallas — out-of-range
    #    rows are never written to the output.
    if B <= 8:
        tb = B
    else:
        tb = min(MAX_TB, _round_up(pl.cdiv(B, 2), 8))
    grid = (pl.cdiv(B, tb),)

    out = pl.pallas_call(
        _linear_kernel,
        out_shape=jax.ShapeDtypeStruct((B, n_pad), jnp.bfloat16),
        grid_spec=pltpu.PrefetchScalarGridSpec(
            num_scalar_prefetch=0,
            grid=grid,
            in_specs=[
                pl.BlockSpec((tb, K), lambda i: (i, 0)),      # streamed per tile (f32)
                pl.BlockSpec((K, n_pad), lambda i: (0, 0)),   # resident weights (bf16)
                pl.BlockSpec((1, n_pad), lambda i: (0, 0)),   # resident bias (f32)
            ],
            out_specs=pl.BlockSpec((tb, n_pad), lambda i: (i, 0)),
        ),
        compiler_params=pltpu.CompilerParams(
            dimension_semantics=("parallel",),                # shard tiles across TCs (v7x)
            vmem_limit_bytes=32 * 1024 * 1024,                # v5e scoped default is 16 MiB
        ),
        cost_estimate=pl.CostEstimate(
            flops=2 * B * K * num_classes,
            transcendentals=0,
            bytes_accessed=B * K * 4 + K * n_pad * 2 + B * n_pad * 2,
        ),
    )(x_flat, w_t_pad, b_pad)

    # Tiny epilogue on [B, 10]: drop lane padding, restore f32 interface.
    # TODO(synk): if a downstream softmax/argmax is ever needed, fuse it into the
    # kernel body (EUP/XLU slots are idle under DMA) instead of an XLA op.
    return out[:, :num_classes].astype(jnp.float32)


def init_params(key, num_classes=NUM_CLASSES, in_features=IN_FEATURES):
    # Deterministic init mimicking nn.Linear's uniform(-1/sqrt(K), 1/sqrt(K)).
    kw, kb = jax.random.split(key)
    bound = 1.0 / (in_features ** 0.5)
    w = jax.random.uniform(kw, (num_classes, in_features), jnp.float32,
                           minval=-bound, maxval=bound)
    b = jax.random.uniform(kb, (num_classes,), jnp.float32,
                           minval=-bound, maxval=bound)
    return w, b


if __name__ == "__main__":
    key = jax.random.PRNGKey(0)
    k_x, k_p = jax.random.split(key)

    # Small MNIST-like batch: [B=2, C=1, H=28, W=28] (K must be 784 for fc1).
    x = jax.random.normal(k_x, (2, 1, 28, 28), jnp.float32)
    w, b = init_params(k_p)

    # One-time param prep (transpose + lane-pad + bf16 cast).
    w_t_pad, b_pad = prepare_params(w, b)

    y = classifier_forward(x, w_t_pad, b_pad)
    y = jax.block_until_ready(y)

    # Sanity check against plain-JAX f32 reference (bf16 matmul/output -> loose tol).
    y_ref = x.reshape(x.shape[0], -1) @ w.T + b
    assert y.shape == (2, NUM_CLASSES)
    assert jnp.allclose(y, y_ref, atol=2e-2, rtol=2e-2)

    print("KERNEL_OK")
</pallas_src>

<mosaic_0001>
module attributes {stable_mosaic.version = 11 : i64} {
  func.func @_linear_kernel(%arg0: i32, %arg1: memref<2x784xf32, #tpu.memory_space<vmem>>, %arg2: memref<784x128xbf16, #tpu.memory_space<vmem>>, %arg3: memref<1x128xf32, #tpu.memory_space<vmem>>, %arg4: memref<2x128xbf16, #tpu.memory_space<vmem>>) attributes {dimension_semantics = [#tpu.dimension_semantics<parallel>], iteration_bounds = array<i64: 1>, scalar_prefetch = 0 : i64, scratch_operands = 0 : i64, tpu.core_type = #tpu.core_type<tc>, window_params = [{transform_indices = @transform_0, window_bounds = array<i64: 2, 784>}, {pipeline_mode = #tpu.pipeline_mode<synchronous>, transform_indices = @transform_1, window_bounds = array<i64: 784, 128>}, {pipeline_mode = #tpu.pipeline_mode<synchronous>, transform_indices = @transform_2, window_bounds = array<i64: 1, 128>}, {transform_indices = @transform_3, window_bounds = array<i64: 2, 128>}]} {
    %c0 = arith.constant 0 : index
    %c0_0 = arith.constant 0 : index
    %0 = vector.load %arg1[%c0, %c0_0] : memref<2x784xf32, #tpu.memory_space<vmem>>, vector<2x784xf32>
    %1 = arith.truncf %0 : vector<2x784xf32> to vector<2x784xbf16>
    %c0_1 = arith.constant 0 : index
    %c0_2 = arith.constant 0 : index
    %2 = vector.load %arg2[%c0_1, %c0_2] : memref<784x128xbf16, #tpu.memory_space<vmem>>, vector<784x128xbf16>
    %cst = arith.constant dense<0.000000e+00> : vector<2x128xf32>
    %3 = tpu.matmul %1, %2, %cst {dimension_numbers = #tpu.dot_dimension_numbers<[1], [0], [0], [1], [0, 0, 1, 1], [], []>} : vector<2x784xbf16>, vector<784x128xbf16>, vector<2x128xf32> -> vector<2x128xf32>
    %c0_3 = arith.constant 0 : index
    %c0_4 = arith.constant 0 : index
    %4 = vector.load %arg3[%c0_3, %c0_4] : memref<1x128xf32, #tpu.memory_space<vmem>>, vector<1x128xf32>
    %5 = vector.broadcast %4 : vector<1x128xf32> to vector<2x128xf32>
    %6 = arith.addf %3, %5 : vector<2x128xf32>
    %7 = arith.truncf %6 : vector<2x128xf32> to vector<2x128xbf16>
    %c0_5 = arith.constant 0 : index
    %c0_6 = arith.constant 0 : index
    %8 = vector.load %arg4[%c0_5, %c0_6] : memref<2x128xbf16, #tpu.memory_space<vmem>>, vector<2x128xbf16>
    tpu.vector_store %arg4[%c0_5, %c0_6], %7 {strides = array<i32>} : memref<2x128xbf16, #tpu.memory_space<vmem>>, vector<2x128xbf16>,
    return
  }
  func.func @transform_0(%arg0: i32) -> (i32, i32) {
    %c0_i32 = arith.constant 0 : i32
    %c0_i32_0 = arith.constant 0 : i32
    return %arg0, %c0_i32 : i32, i32
  }
  func.func @transform_1(%arg0: i32) -> (i32, i32) {
    %c0_i32 = arith.constant 0 : i32
    %c0_i32_0 = arith.constant 0 : i32
    %c0_i32_1 = arith.constant 0 : i32
    return %c0_i32, %c0_i32_0 : i32, i32
  }
  func.func @transform_2(%arg0: i32) -> (i32, i32) {
    %c0_i32 = arith.constant 0 : i32
    %c0_i32_0 = arith.constant 0 : i32
    %c0_i32_1 = arith.constant 0 : i32
    return %c0_i32, %c0_i32_0 : i32, i32
  }
  func.func @transform_3(%arg0: i32) -> (i32, i32) {
    %c0_i32 = arith.constant 0 : i32
    %c0_i32_0 = arith.constant 0 : i32
    return %arg0, %c0_i32 : i32, i32
  }
}

</mosaic_0001>

<bundles_post_ra>
// kernel: tpu_custom_call.1
= control target key start
LH: loop header
LB: loop body
LE: loop exit
PB: predicated region body
PF: predicated region fallthrough
CT: control target
= control target key end

     0   :  { %8 = vsyncpa [#allocation3], 0  ;;  %s964_s0 = inlined_call_operand.hbm [shape: f32[2,784], index: 0, kind: input, shape index: {}]   ;;  %s965_s1 = inlined_call_operand.hbm [shape: bf16[784,128], index: 1, kind: input, shape index: {}]   ;;  %s966_s2 = inlined_call_operand.vmem [shape: f32[1,128], index: 2, kind: input, shape index: {}]   ;;  %s967_s3 = inlined_call_operand.hbm [shape: bf16[2,128], index: 3, kind: output, shape index: {}]  }
   0x1   :  { %9 = vsyncpa [#allocation6], 0 }
   0x2   :  { %10 = vsyncpa [#allocation4], 0  ;;  %s924_s12 = smov [#allocation2]   ;;  %s925_s14 = smov [#allocation5]  }
   0x3   :  { %s17_s13 = sshll.u32 %s924_s12, 4  ;;  %s26_s15 = sshll.u32 %s925_s14, 4  ;;  %s18_s13 = int_to_ptr.vmem [resolvable:$true] %s17_s13  ;;  %s27_s15 = int_to_ptr.vmem [resolvable:$true] %s26_s15 }
   0x4   :  { %s866_s16 = scalar_lea.vmem %s18_s13, 224  ;;  %p871_p1 = scmp.lt.s32.totalorder %s18_s13, %s18_s13 }
   0x5   :  { %p867_p0 = scmp.ne.s32.totalorder %s18_s13, %s866_s16  ;;  %p872_p2 = scmp.lt.s32.totalorder %s866_s16, %s866_s16 }
   0x7   :  { %p873_p3 = por %p872_p2, %p871_p1 }
   0x9   :  { %p874_p4 = pnand %p873_p3, %p867_p0 }
   0xb   :  { %877 = shalt.err (!%p874_p4)
}
   0xc   :  { %20 = dma.hbm_to_vmem [thread:$0]  %s964_s0, 224, %s18_s13, [#allocation3]  }
   0xd   :  { %s886_s19 = scalar_lea.vmem %s27_s15, 6272  ;;  %p891_p6 = scmp.lt.s32.totalorder %s27_s15, %s27_s15 }
   0xe   :  { %p887_p5 = scmp.ne.s32.totalorder %s27_s15, %s886_s19  ;;  %p892_p7 = scmp.lt.s32.totalorder %s886_s19, %s886_s19 }
  0x10   :  { %p893_p8 = por %p892_p7, %p891_p6 }
  0x12   :  { %p894_p9 = pnand %p893_p8, %p887_p5 }
  0x14   :  { %897 = shalt.err (!%p894_p9)
}
  0x15   :  { %s926_s20 = smov 64   ;;  %s927_s21 = smov 4  }
  0x16   :  { %32 = dma.hbm_to_vmem [thread:$0]  %s965_s1, 6272, %s27_s15, [#allocation6], %s926_s20, %s926_s20, %s927_s21  }
  0x17   :  { %918 = dma.done.wait [#allocation3], 224  }
  0x18   :  { %919 = vsyncadd [#allocation3], 4294967072 }
  0x19   :  { %920 = dma.done.wait [#allocation6], 6272  }
  0x1a   :  { %921 = vsyncadd [#allocation6], 4294961024  ;;  %v807_v0 = vld [vmem:[#allocation5 + $0x78] sm:$0xff]   ;;  %v811_v4 = vld [vmem:[#allocation5 + $0x70] sm:$0xff]   ;;  %v928_v21 = vmov 1983009808   ;;  %v50_v23 = vlaneseq }
  0x1b   :  { %v808_v1 = vld [vmem:[#allocation5 + $0x38] sm:$0xff]   ;;  %725 = vmatprep.subr.bf16.mxu0 %v807_v0  ;;  %v812_v5 = vld [vmem:[#allocation5 + $0x30] sm:$0xff]   ;;  %v815_v8 = vld [vmem:[#allocation5 + $0x68] sm:$0xff]   ;;  %v48_v22 = vunpack.c.l.s4 %v928_v21  ;;  %v929_v45 = vmov 0.0   ;;  %vm930_vm0 = vmmov 0   ;;  %vm492_vm1 = vcmask 130048  }
  0x1c   :  { %v809_v2 = vld [vmem:[#allocation5 + $0xf8] sm:$0xff]   ;;  %726 = vmatpush3.bf16.msra.mxu0 %v808_v1  ;;  %v813_v6 = vld [vmem:[#allocation5 + $0xf0] sm:$0xff]   ;;  %v816_v9 = vld [vmem:[#allocation5 + $0x28] sm:$0xff]   ;;  %v51_v29 = vshrl.u32 %v50_v23, 7  ;;  %s931_s24 = smov [#allocation7]  }
  0x1d   :  { %v810_v3 = vld [vmem:[#allocation5 + $0xb8] sm:$0xff]   ;;  %747 = vmatprep.subr.bf16.mxu1 %v809_v2  ;;  %727 = vmatprep.subr.bf16.mxu0 %v811_v4  ;;  %v814_v7 = vld [vmem:[#allocation5 + $0xb0] sm:$0xff]   ;;  %v817_v10 = vld [vmem:[#allocation5 + $0xe8] sm:$0xff]   ;;  %v49_v28 = vunpack.c.0.s8 %v48_v22  ;;  %s664_s25 = sshll.u32 %s931_s24, 4  ;;  %s665_s25 = int_to_ptr.vmem [resolvable:$true] %s664_s25 }
  0x1e   :  { %748 = vmatpush3.bf16.msra.mxu1 %v810_v3  ;;  %v818_v11 = vld [vmem:[#allocation5 + $0xa8] sm:$0xff]   ;;  %v819_v12 = vld [vmem:[#allocation5 + $0x60] sm:$0xff]   ;;  %v823_v16 = vld [vmem:[#allocation5 + $0x58] sm:$0xff]   ;;  %s898_s26 = scalar_lea.vmem %s665_s25, 16  ;;  %s902_s27 = scalar_lea.vmem %s665_s25, 32 }
  0x1f   :  { %749 = vmatprep.subr.bf16.mxu1 %v813_v6  ;;  %v820_v13 = vld [vmem:[#allocation5 + $0x20] sm:$0xff]   ;;  %v824_v17 = vld [vmem:[#allocation5 + $0x18] sm:$0xff]   ;;  %v827_v20 = vld [vmem:[#allocation5 + $0x50] sm:$0xff]   ;;  %v52_v34 = vsub.s32 %v49_v28, %v51_v29  ;;  %p899_p10 = scmp.ne.s32.totalorder %s665_s25, %s898_s26  ;;  %p903_p11 = scmp.lt.s32.totalorder %s665_s25, %s665_s25 }
  0x20   :  { %728 = vmatpush3.bf16.msra.mxu0 %v812_v5  ;;  %v821_v14 = vld [vmem:[#allocation5 + $0xe0] sm:$0xff]   ;;  %v825_v18 = vld [vmem:[#allocation5 + $0xd8] sm:$0xff]   ;;  %v828_v24 = vld [vmem:[#allocation5 + $0x10] sm:$0xff]   ;;  %p904_p12 = scmp.lt.s32.totalorder %s902_s27, %s898_s26 }
  0x21   :  { %729 = vmatprep.subr.bf16.mxu0 %v815_v8  ;;  %v822_v15 = vld [vmem:[#allocation5 + $0xa0] sm:$0xff]   ;;  %v826_v19 = vld [vmem:[#allocation5 + $0x98] sm:$0xff]   ;;  %v829_v25 = vld [vmem:[#allocation5 + $0xd0] sm:$0xff]  }
  0x22   :  { %750 = vmatpush3.bf16.msra.mxu1 %v814_v7  ;;  %v830_v26 = vld [vmem:[#allocation5 + $0x90] sm:$0xff]   ;;  %v831_v27 = vld [vmem:[#allocation5 + $0x48] sm:$0xff]   ;;  %v835_v33 = vld [vmem:[#allocation5 + $0x40] sm:$0xff]   ;;  %p905_p13 = por %p904_p12, %p903_p11 }
  0x23   :  { %751 = vmatprep.subr.bf16.mxu1 %v817_v10  ;;  %v832_v30 = vld [vmem:[#allocation5 + $0x8] sm:$0xff]   ;;  %v836_v35 = vld [vmem:[#allocation5] sm:$0xff]   ;;  %v42_v37 = vld [vmem:[#allocation2] sm:$0xff] }
  0x24   :  { %730 = vmatpush3.bf16.msra.mxu0 %v816_v9  ;;  %v833_v31 = vld [vmem:[#allocation5 + $0xc8] sm:$0xff]   ;;  %v837_v36 = vld [vmem:[#allocation5 + $0xc0] sm:$0xff]   ;;  %v53_v38 = vrot.slane %v42_v37, %v52_v34  ;;  %v46_v40 = vcombine.high %v42_v37, %v42_v37  ;;  %v839_v41 = vld [vmem:[#allocation5 + $0x178] sm:$0xff]   ;;  %p906_p0 = pnand %p905_p13, %p899_p10 }
  0x25   :  { %731 = vmatprep.subr.bf16.mxu0 %v819_v12  ;;  %v834_v32 = vld [vmem:[#allocation5 + $0x88] sm:$0xff]   ;;  %v838_v39 = vld [vmem:[#allocation5 + $0x80] sm:$0xff]   ;;  %v841_v48 = vld [vmem:[#allocation5 + $0x138] sm:$0xff]  }
  0x26   :  { %752 = vmatpush3.bf16.msra.mxu1 %v818_v11  ;;  %v61_v42 = vcombine.high %v53_v38, %v53_v38  ;;  %v60_v43 = vrot.slane %v46_v40, %v52_v34  ;;  %v86_v44 = vpack.c.bf16 %v53_v38, %v53_v38  ;;  %v842_v50 = vld [vmem:[#allocation5 + $0x170] sm:$0xff]   ;;  %v844_v53 = vld [vmem:[#allocation5 + $0x168] sm:$0xff]   ;;  %v846_v55 = vld [vmem:[#allocation5 + $0x160] sm:$0xff]  }
  0x27   :  { %753 = vmatprep.subr.bf16.mxu1 %v821_v14  ;;  %v843_v52 = vld [vmem:[#allocation5 + $0x130] sm:$0xff]   ;;  %v845_v54 = vld [vmem:[#allocation5 + $0x128] sm:$0xff]   ;;  %v847_v56 = vld [vmem:[#allocation5 + $0x120] sm:$0xff]  }
  0x28   :  { %732 = vmatpush3.bf16.msra.mxu0 %v820_v13  ;;  %v87_v46 = vpack.c.bf16 %v61_v42, %v61_v42  ;;  %v62_v47 = vcombine.high %v60_v43, %v60_v43  ;;  %v88_v49 = vpack.c.bf16 %v60_v43, %v60_v43  ;;  %v848_v57 = vld [vmem:[#allocation5 + $0x158] sm:$0xff]   ;;  %v856_v58 = vld [vmem:[#allocation5 + $0x180] sm:$0xff]   ;;  %v850_v1 = vld [vmem:[#allocation5 + $0x150] sm:$0xff]  }
  0x29   :  { %733 = vmatprep.subr.bf16.mxu0 %v823_v16  ;;  %v43_v59 = vld [vmem:[#allocation2 + $0x8] sm:$0x3f]  ;;  %v851_v4 = vld [vmem:[#allocation5 + $0x110] sm:$0xff]   ;;  %v852_v5 = vld [vmem:[#allocation5 + $0x148] sm:$0xff]  }
  0x2a   :  { %754 = vmatpush3.bf16.msra.mxu1 %v822_v15  ;;  %528 = vmatprep.mubr.bf16.mxu0 %v87_v46  ;;  %v89_v51 = vpack.c.bf16 %v62_v47, %v62_v47  ;;  %v63_v60 = vcombine.high %v43_v59, %v43_v59  ;;  %v70_v61 = vrot.slane %v43_v59, %v52_v34  ;;  %v849_v62 = vld [vmem:[#allocation5 + $0x118] sm:$0xff]   ;;  %v853_v6 = vld [vmem:[#allocation5 + $0x108] sm:$0xff]   ;;  %v854_v7 = vld [vmem:[#allocation5 + $0x140] sm:$0xff]  }
  0x2b   :  { %755 = vmatprep.subr.bf16.mxu1 %v825_v18  ;;  %v855_v8 = vld [vmem:[#allocation5 + $0x100] sm:$0xff]   ;;  %v674_v23 = vld [vmem:[%s966_s2] ss:$0 sm:$0xff] }
  0x2c   :  { %734 = vmatpush3.bf16.msra.mxu0 %v824_v17  ;;  %568 = vmatprep.mubr.bf16.mxu1 %v89_v51  ;;  %v77_v63 = vrot.slane %v63_v60, %v52_v34  ;;  %v78_v0 = vcombine.high %v70_v61, %v70_v61  ;;  %v90_v9 = vpack.c.bf16 %v70_v61, %v70_v61 }
  0x2d   :  { %735 = vmatprep.subr.bf16.mxu0 %v827_v20 }
  0x2e   :  { %756 = vmatpush3.bf16.msra.mxu1 %v826_v19  ;;  %v91_v2 = vpack.c.bf16 %v78_v0, %v78_v0  ;;  %v92_v3 = vpack.c.bf16 %v77_v63, %v77_v63 }
  0x2f   :  { %757 = vmatprep.subr.bf16.mxu1 %v829_v25 }
  0x30   :  { %736 = vmatpush3.bf16.msra.mxu0 %v828_v24 }
  0x31   :  { %737 = vmatprep.subr.bf16.mxu0 %v831_v27 }
  0x32   :  { %758 = vmatpush3.bf16.msra.mxu1 %v830_v26 }
  0x33   :  { %759 = vmatprep.subr.bf16.mxu1 %v833_v31 }
  0x34   :  { %738 = vmatpush3.bf16.msra.mxu0 %v832_v30 }
  0x35   :  { %739 = vmatprep.subr.bf16.mxu0 %v835_v33 }
  0x36   :  { %760 = vmatpush3.bf16.msra.mxu1 %v834_v32 }
  0x37   :  { %761 = vmatprep.subr.bf16.mxu1 %v837_v36 }
  0x38   :  { %740 = vmatpush3.bf16.msra.mxu0 %v836_v35 }
  0x39   :  { %769 = vmatprep.subr.bf16.mxu0 %v839_v41 }
  0x3a   :  { %762 = vmatpush3.bf16.msra.mxu1 %v838_v39 }
  0x3b   :  { %793 = vmatprep.subr.bf16.mxu1 %v929_v45  ;;  %529 = vmatmul.mubr.bf16.vlgmr.msra.gmra.mxu0 %v86_v44 }
  0x3c   :  { %770 = vmatpush3.bf16.msra.mxu0 %v841_v48  ;;  %608 = vmatprep.mubr.bf16.mxu0 %v91_v2 }
  0x3d   :  { %569 = vmatmul.mubr.bf16.vlgmr.msra.gmra.mxu1 %v88_v49  ;;  %771 = vmatprep.subr.bf16.mxu0 %v842_v50 }
  0x3e   :  { %795 = vmatprep.mubr.msk.bf16.mxu1 %vm930_vm0, %v929_v45  ;;  %794 = vmatpush3.bf16.msra.mxu1 %v856_v58 }
  0x40   :  { %772 = vmatpush3.bf16.msra.mxu0 %v843_v52 }
  0x41   :  { %773 = vmatprep.subr.bf16.mxu0 %v844_v53 }
  0x44   :  { %774 = vmatpush3.bf16.msra.mxu0 %v845_v54 }
  0x45   :  { %775 = vmatprep.subr.bf16.mxu0 %v846_v55  ;;  %796 = vmatmul.mubr.msk.bf16.vlgmr.msra.gmra.mxu1 %vm492_vm1, %v92_v3 }
  0x48   :  { %776 = vmatpush3.bf16.msra.mxu0 %v847_v56 }
  0x49   :  { %777 = vmatprep.subr.bf16.mxu0 %v848_v57 }
  0x4c   :  { %778 = vmatpush3.bf16.msra.mxu0 %v849_v62 }
  0x4d   :  { %779 = vmatprep.subr.bf16.mxu0 %v850_v1 }
  0x50   :  { %780 = vmatpush3.bf16.msra.mxu0 %v851_v4 }
  0x51   :  { %781 = vmatprep.subr.bf16.mxu0 %v852_v5 }
  0x54   :  { %782 = vmatpush3.bf16.msra.mxu0 %v853_v6 }
  0x55   :  { %783 = vmatprep.subr.bf16.mxu0 %v854_v7 }
  0x58   :  { %784 = vmatpush3.bf16.msra.mxu0 %v855_v8 }
  0x5b   :  { %609 = vmatmul.mubr.bf16.vlgmr.msra.gmra.mxu0 %v90_v9 }
  0xfb   :  { %v741_v10 = vpop.f32.mrf.mxu0 }
  0xfd   :  { %v742_v11 = vpop.f32.mrf.mxu0  ;;  %v763_v12 = vpop.f32.mrf.mxu1 }
  0xfe   :  { %v743_v22 = vadd.f32 %v742_v11, %v741_v10 }
  0xff   :  { %v744_v13 = vpop.f32.mrf.mxu0  ;;  %v764_v14 = vpop.f32.mrf.mxu1 }
 0x100   :  { %v531_v24 = vadd.f32 %v743_v22, %v674_v23  ;;  %v765_v25 = vadd.f32 %v764_v14, %v763_v12 }
 0x101   :  { %v745_v15 = vpop.f32.mrf.mxu0  ;;  %v766_v16 = vpop.f32.mrf.mxu1 }
 0x102   :  { %v571_v28 = vadd.f32 %v765_v25, %v531_v24 }
 0x103   :  { %v767_v17 = vpop.f32.mrf.mxu1 }
 0x105   :  { %v650_v18 = vpop.f32.mrf.mxu1 }
 0x107   :  { %v797_v19 = vpop.f32.mrf.mxu1 }
 0x109   :  { %v653_v20 = vpop.f32.mrf.mxu1 }
 0x10b   :  { %v798_v21 = vpop.f32.mrf.mxu1 }
 0x11b   :  { %v785_v26 = vpop.f32.mrf.mxu0 }
 0x11d   :  { %v786_v27 = vpop.f32.mrf.mxu0 }
 0x11e   :  { %v787_v29 = vadd.f32 %v786_v27, %v785_v26 }
 0x11f   :  { %v788_v30 = vpop.f32.mrf.mxu0 }
 0x120   :  { %v611_v31 = vadd.f32 %v787_v29, %v571_v28 }
 0x121   :  { %v789_v32 = vpop.f32.mrf.mxu0 }
 0x122   :  { %v651_v33 = vadd.f32 %v650_v18, %v611_v31 }
 0x124   :  { %v656_v34 = vpack.c.bf16 %v651_v33, %v651_v33 }
 0x126   :  { %657 = vst [vmem:[#allocation7] sm:$0x1] %v656_v34 }
 0x127   :  { %909 = shalt.err (!%p906_p0)
}
 0x128   :  { %667 = dma.vmem_to_hbm [thread:$0]  %s665_s25, 16, %s967_s3, [#allocation4]  }
 0x129   :  { %922 = dma.done.wait [#allocation4], 16  }
 0x12a   :  { %923 = vsyncadd [#allocation4], 4294967280 }
 0x12b   :  { %671 = vsyncpa [#allocation3], 1 }
 0x12c   :  { %672 = vsyncpa [#allocation6], 1 }
 0x12d   :  { %673 = vsyncpa [#allocation4], 1 }

</bundles_post_ra>
